<compile_context>
chip_gen: v7x
topology: tpu7x:2x2x1
jax: 0.10.0
libtpu: 0.0.40
codegen_flags: <defaults>
</compile_context>

<pallas_src>
import jax
import jax.numpy as jnp
from jax.experimental import pallas as pl
from jax.experimental.pallas import tpu as pltpu


def attention_kernel(x_ref, w2bd_ref, seg_ref, h_ref):
    """One tile of packed graphs.

    x_ref   : (Rt, N, 128) VMEM  P = 8 graphs packed per 128-lane row
    w2bd_ref: (128, 128)   VMEM  block-diagonal W2  (kron(I_P, W2))
    seg_ref : (128, 128)   VMEM  segment-sum matrix (kron(I_P, ones(D, D)))
    h_ref   : (Rt, 128)    VMEM  packed graph embeddings
    """
    x = x_ref[...]                                      # (Rt, N, 128) f32
    rt, n, lanes = x.shape

    # c = tanh(mean(x, nodes) @ W2)  (== tanh(mean(x @ W2, nodes)) by linearity).
    # Block-diagonal W2 keeps each packed graph inside its own 16-lane segment
    # while filling the full 128x128 MXU footprint.
    x_mean = jnp.sum(x, axis=1) * (1.0 / n)             # (Rt, 128) sublane reduce
    c = jnp.tanh(jnp.dot(x_mean, w2bd_ref[...],
                         preferred_element_type=jnp.float32))        # (Rt, 128)

    # score_i = sigmoid(<x_i, c>): segmented 16-lane dot product, done as one
    # lane-dense MXU matmul against the 0/1 segment matrix; the result is
    # already replicated across each graph's 16-lane segment.
    prod = x * c[:, None, :]                            # (Rt, N, 128) VPU
    seg_sums = jnp.dot(prod.reshape(rt * n, lanes), seg_ref[...],
                       preferred_element_type=jnp.float32)
    scores = jax.nn.sigmoid(seg_sums.reshape(rt, n, lanes))   # (Rt, N, 128) EUP

    # h = sum_i score_i * x_i: full-width VPU mul + sublane reduce.
    h = jnp.sum(scores * x, axis=1)                     # (Rt, 128)
    h_ref[...] = h.astype(h_ref.dtype)


def attention_module_batched(x, w2, *, block_rows=512):
    """x: (B, N, D) f32, w2: (D, D) f32 -> h: (B, D) f32 (row b == graph b)."""
    b, n, d = x.shape
    assert 128 % d == 0, "lane packing assumes D divides 128 (SimGNN: D = 16)"
    p = 128 // d                       # graphs packed per 128-lane row
    lanes = p * d                      # == 128

    # Pad the batch so the packed-row count is a multiple of the tile size
    # (and of 8, for (8, 128) alignment).  Padded graphs are zeros; their
    # (finite) outputs are sliced away below.
    rows = pl.cdiv(b, p)
    rows = pl.cdiv(rows, 8) * 8
    block_rows = max(8, min(block_rows, rows))
    block_rows = pl.cdiv(block_rows, 8) * 8
    grid_r = pl.cdiv(rows, block_rows)
    rows_pad = grid_r * block_rows
    b_pad = rows_pad * p
    if b_pad != b:
        x = jnp.pad(x, ((0, b_pad - b), (0, 0), (0, 0)))

    # Lane-pack: (B, N, D) -> (rows, N, P*D).  Pure layout plumbing in XLA.
    x_packed = (x.reshape(rows_pad, p, n, d)
                 .transpose(0, 2, 1, 3)
                 .reshape(rows_pad, n, lanes))
    w2bd = jnp.kron(jnp.eye(p, dtype=w2.dtype), w2)                       # (128, 128)
    seg = jnp.kron(jnp.eye(p, dtype=x.dtype), jnp.ones((d, d), x.dtype))  # (128, 128)

    h_packed = pl.pallas_call(
        attention_kernel,
        out_shape=jax.ShapeDtypeStruct((rows_pad, lanes), jnp.float32),
        grid_spec=pltpu.PrefetchScalarGridSpec(
            num_scalar_prefetch=0,
            grid=(grid_r,),
            in_specs=[
                pl.BlockSpec((block_rows, n, lanes), lambda i: (i, 0, 0)),
                pl.BlockSpec((lanes, lanes), lambda i: (0, 0)),   # W2_bd: resident
                pl.BlockSpec((lanes, lanes), lambda i: (0, 0)),   # seg:   resident
            ],
            out_specs=pl.BlockSpec((block_rows, lanes), lambda i: (i, 0)),
        ),
        # Batch-of-rows axis is embarrassingly parallel.  On v7x this can be
        # swapped for pltpu.CORE_PARALLEL to shard the grid across both
        # TensorCores; "parallel" is kept here for portability (v5e/v6e/v7x).
        compiler_params=pltpu.CompilerParams(
            dimension_semantics=("parallel",),
            vmem_limit_bytes=32 * 1024 * 1024),
    )(x_packed, w2bd, seg)

    # Unpack the lane-dense output slab (rows, 128) -> (B, D).
    return h_packed.reshape(rows_pad * p, d)[:b]


def attention_module(x, w2):
    """Original PyTorch signature: x (N, D) -> h (1, D)."""
    return attention_module_batched(x[None], w2)


def xavier_uniform(key, shape, dtype=jnp.float32):
    fan_in, fan_out = shape[0], shape[1]
    bound = (6.0 / (fan_in + fan_out)) ** 0.5
    return jax.random.uniform(key, shape, dtype, minval=-bound, maxval=bound)


def reference(x, w2):
    """Direct transcription of the PyTorch forward (per graph)."""
    hi = jax.lax.Precision.HIGHEST
    c = jnp.tanh(jnp.mean(jnp.matmul(x, w2, precision=hi), axis=0)).reshape(1, -1)
    s = jax.nn.sigmoid(jnp.matmul(x, c.T, precision=hi))
    h = jnp.matmul(x.T, s, precision=hi).T
    return h


if __name__ == "__main__":
    # filters_3 = 16 (SimGNN embedding dim), N = 8 nodes per graph,
    # B = 16 graphs batched into one pallas_call.
    B, N, D = 16, 8, 16
    key = jax.random.PRNGKey(0)
    kx, kw = jax.random.split(key)

    x = jax.random.normal(kx, (B, N, D), dtype=jnp.float32)
    W2 = xavier_uniform(kw, (D, D))

    # Batched path (the intended high-throughput form).
    h_batched = attention_module_batched(x, W2)
    jax.block_until_ready(h_batched)
    h_ref_batched = jax.vmap(lambda xi: reference(xi, W2)[0])(x)
    assert h_batched.shape == (B, D)
    assert jnp.allclose(h_batched, h_ref_batched, atol=1e-4, rtol=1e-4)

    # Ragged batch (exercises the pad-to-tile path that replaced the old
    # `block_b = b` fallback).
    h_ragged = attention_module_batched(x[:13], W2)
    jax.block_until_ready(h_ragged)
    assert h_ragged.shape == (13, D)
    assert jnp.allclose(h_ragged, h_ref_batched[:13], atol=1e-4, rtol=1e-4)

    # Original single-graph signature (semantics of the PyTorch module).
    h_single = attention_module(x[0], W2)
    jax.block_until_ready(h_single)
    h_ref_single = reference(x[0], W2)
    assert h_single.shape == (1, D)
    assert jnp.allclose(h_single, h_ref_single, atol=1e-4, rtol=1e-4)

    print("KERNEL_OK")
</pallas_src>

<mosaic_0001>
module attributes {stable_mosaic.version = 11 : i64} {
  func.func @attention_kernel(%arg0: i32, %arg1: memref<8x8x128xf32, #tpu.memory_space<vmem>>, %arg2: memref<128x128xf32, #tpu.memory_space<vmem>>, %arg3: memref<128x128xf32, #tpu.memory_space<vmem>>, %arg4: memref<8x128xf32, #tpu.memory_space<vmem>>) attributes {dimension_semantics = [#tpu.dimension_semantics<parallel>], iteration_bounds = array<i64: 1>, scalar_prefetch = 0 : i64, scratch_operands = 0 : i64, tpu.core_type = #tpu.core_type<tc>, window_params = [{transform_indices = @transform_0, window_bounds = array<i64: 8, 8, 128>}, {pipeline_mode = #tpu.pipeline_mode<synchronous>, transform_indices = @transform_1, window_bounds = array<i64: 128, 128>}, {pipeline_mode = #tpu.pipeline_mode<synchronous>, transform_indices = @transform_2, window_bounds = array<i64: 128, 128>}, {transform_indices = @transform_3, window_bounds = array<i64: 8, 128>}]} {
    %c0 = arith.constant 0 : index
    %c0_0 = arith.constant 0 : index
    %c0_1 = arith.constant 0 : index
    %0 = vector.load %arg1[%c0, %c0_0, %c0_1] : memref<8x8x128xf32, #tpu.memory_space<vmem>>, vector<8x8x128xf32>
    %cst = arith.constant dense<0.000000e+00> : vector<8x128xf32>
    %1 = vector.multi_reduction <add>, %0, %cst [1] : vector<8x8x128xf32> to vector<8x128xf32>
    %cst_2 = arith.constant 1.250000e-01 : f32
    %2 = vector.broadcast %cst_2 : f32 to vector<8x128xf32>
    %3 = arith.mulf %1, %2 : vector<8x128xf32>
    %c0_3 = arith.constant 0 : index
    %c0_4 = arith.constant 0 : index
    %4 = vector.load %arg2[%c0_3, %c0_4] : memref<128x128xf32, #tpu.memory_space<vmem>>, vector<128x128xf32>
    %cst_5 = arith.constant dense<0.000000e+00> : vector<8x128xf32>
    %5 = tpu.matmul %3, %4, %cst_5 {dimension_numbers = #tpu.dot_dimension_numbers<[1], [0], [0], [1], [0, 0, 1, 1], [], []>} : vector<8x128xf32>, vector<128x128xf32>, vector<8x128xf32> -> vector<8x128xf32>
    %6 = math.tanh %5 : vector<8x128xf32>
    %7 = vector.shape_cast %6 : vector<8x128xf32> to vector<8x1x128xf32>
    %8 = vector.broadcast %7 : vector<8x1x128xf32> to vector<8x8x128xf32>
    %9 = arith.mulf %0, %8 : vector<8x8x128xf32>
    %10 = vector.shape_cast %9 : vector<8x8x128xf32> to vector<64x128xf32>
    %c0_6 = arith.constant 0 : index
    %c0_7 = arith.constant 0 : index
    %11 = vector.load %arg3[%c0_6, %c0_7] : memref<128x128xf32, #tpu.memory_space<vmem>>, vector<128x128xf32>
    %cst_8 = arith.constant dense<0.000000e+00> : vector<64x128xf32>
    %12 = tpu.matmul %10, %11, %cst_8 {dimension_numbers = #tpu.dot_dimension_numbers<[1], [0], [0], [1], [0, 0, 1, 1], [], []>} : vector<64x128xf32>, vector<128x128xf32>, vector<64x128xf32> -> vector<64x128xf32>
    %13 = vector.shape_cast %12 : vector<64x128xf32> to vector<8x8x128xf32>
    %14 = arith.negf %13 : vector<8x8x128xf32>
    %15 = math.exp %14 : vector<8x8x128xf32>
    %cst_9 = arith.constant 1.000000e+00 : f32
    %16 = vector.broadcast %cst_9 : f32 to vector<8x8x128xf32>
    %17 = arith.addf %16, %15 : vector<8x8x128xf32>
    %18 = arith.divf %16, %17 : vector<8x8x128xf32>
    %19 = arith.mulf %18, %0 : vector<8x8x128xf32>
    %cst_10 = arith.constant dense<0.000000e+00> : vector<8x128xf32>
    %20 = vector.multi_reduction <add>, %19, %cst_10 [1] : vector<8x8x128xf32> to vector<8x128xf32>
    %c0_11 = arith.constant 0 : index
    %c0_12 = arith.constant 0 : index
    %21 = vector.load %arg4[%c0_11, %c0_12] : memref<8x128xf32, #tpu.memory_space<vmem>>, vector<8x128xf32>
    tpu.vector_store %arg4[%c0_11, %c0_12], %20 {strides = array<i32>} : memref<8x128xf32, #tpu.memory_space<vmem>>, vector<8x128xf32>,
    return
  }
  func.func @transform_0(%arg0: i32) -> (i32, i32, i32) {
    %c0_i32 = arith.constant 0 : i32
    %c0_i32_0 = arith.constant 0 : i32
    %c0_i32_1 = arith.constant 0 : i32
    return %arg0, %c0_i32, %c0_i32_0 : i32, i32, i32
  }
  func.func @transform_1(%arg0: i32) -> (i32, i32) {
    %c0_i32 = arith.constant 0 : i32
    %c0_i32_0 = arith.constant 0 : i32
    %c0_i32_1 = arith.constant 0 : i32
    return %c0_i32, %c0_i32_0 : i32, i32
  }
  func.func @transform_2(%arg0: i32) -> (i32, i32) {
    %c0_i32 = arith.constant 0 : i32
    %c0_i32_0 = arith.constant 0 : i32
    %c0_i32_1 = arith.constant 0 : i32
    return %c0_i32, %c0_i32_0 : i32, i32
  }
  func.func @transform_3(%arg0: i32) -> (i32, i32) {
    %c0_i32 = arith.constant 0 : i32
    %c0_i32_0 = arith.constant 0 : i32
    return %arg0, %c0_i32 : i32, i32
  }
}

</mosaic_0001>

<bundles_post_ra>
// kernel: tpu_custom_call.1
= control target key start
LH: loop header
LB: loop body
LE: loop exit
PB: predicated region body
PF: predicated region fallthrough
CT: control target
= control target key end

     0   :  { %8 = vsyncpa [#allocation3], 0  ;;  %s1081_s0 = inlined_call_operand.hbm [shape: f32[8,8,128], index: 0, kind: input, shape index: {}]   ;;  %s1082_s1 = inlined_call_operand.hbm [shape: f32[128,128], index: 1, kind: input, shape index: {}]   ;;  %s1083_s2 = inlined_call_operand.hbm [shape: f32[128,128], index: 2, kind: input, shape index: {}]   ;;  %s1084_s3 = inlined_call_operand.hbm [shape: f32[8,128], index: 3, kind: output, shape index: {}]  }
   0x1   :  { %9 = vsyncpa [#allocation6], 0 }
   0x2   :  { %10 = vsyncpa [#allocation4], 0  ;;  %s908_s12 = smov [#allocation5]   ;;  %s909_s14 = smov [#allocation2]  }
   0x3   :  { %s28_s13 = sshll.u32 %s908_s12, 4  ;;  %s16_s15 = sshll.u32 %s909_s14, 4  ;;  %s29_s13 = int_to_ptr.vmem [resolvable:$true] %s28_s13  ;;  %s938_s15 = int_to_ptr.vmem [resolvable:$true] %s16_s15 }
   0x4   :  { %s814_s18 = scalar_lea.hbm %s1082_s1, 2048 }
   0x5   :  { %p815_p0 = scmp.ne.s32.totalorder %s1082_s1, %s814_s18  ;;  %p818_p1 = scmp.lt.u32.totalorder %s814_s18, %s1082_s1 }
   0x7   :  { %p820_p2 = pnand %p818_p1, %p815_p0 }
   0x9   :  { %823 = shalt.err (!%p820_p2)
}
   0xa   :  { %s824_s23 = scalar_lea.vmem %s29_s13, 2048  ;;  %p829_p4 = scmp.lt.s32.totalorder %s29_s13, %s29_s13 }
   0xb   :  { %p825_p3 = scmp.ne.s32.totalorder %s29_s13, %s824_s23  ;;  %p830_p5 = scmp.lt.s32.totalorder %s824_s23, %s824_s23 }
   0xd   :  { %p831_p6 = por %p830_p5, %p829_p4 }
   0xf   :  { %p832_p7 = pnand %p831_p6, %p825_p3 }
  0x11   :  { %835 = shalt.err (!%p832_p7)
}
  0x12   :  { %s910_s24 = smov 128   ;;  %s911_s25 = smov 8  }
  0x13   :  { %34 = dma.hbm_to_vmem [thread:$0]  %s1082_s1, 2048, %s29_s13, [#allocation6], %s910_s24, %s910_s24, %s911_s25  }
  0x14   :  { %s836_s30 = scalar_lea.hbm %s1081_s0, 1024 }
  0x15   :  { %p837_p8 = scmp.ne.s32.totalorder %s1081_s0, %s836_s30  ;;  %p840_p9 = scmp.lt.u32.totalorder %s836_s30, %s1081_s0 }
  0x17   :  { %p842_p10 = pnand %p840_p9, %p837_p8 }
  0x19   :  { %845 = shalt.err (!%p842_p10)
}
  0x1a   :  { %s846_s8 = scalar_lea.vmem %s938_s15, 1024  ;;  %p851_p12 = scmp.lt.s32.totalorder %s938_s15, %s938_s15 }
  0x1b   :  { %p847_p11 = scmp.ne.s32.totalorder %s938_s15, %s846_s8  ;;  %p852_p13 = scmp.lt.s32.totalorder %s846_s8, %s846_s8 }
  0x1d   :  { %p853_p0 = por %p852_p13, %p851_p12 }
  0x1f   :  { %p854_p1 = pnand %p853_p0, %p847_p11 }
  0x21   :  { %857 = shalt.err (!%p854_p1)
}
  0x22   :  { %22 = dma.hbm_to_vmem [thread:$0]  %s1081_s0, 1024, %s938_s15, [#allocation3], %s910_s24, %s910_s24, %s911_s25  }
  0x23   :  { %s912_s10 = smov [#allocation7]   ;;  %s858_s14 = scalar_lea.hbm %s1083_s2, 2048 }
  0x24   :  { %s40_s11 = sshll.u32 %s912_s10, 4  ;;  %p859_p2 = scmp.ne.s32.totalorder %s1083_s2, %s858_s14  ;;  %s41_s11 = int_to_ptr.vmem [resolvable:$true] %s40_s11 }
  0x25   :  { %p862_p3 = scmp.lt.u32.totalorder %s858_s14, %s1083_s2 }
  0x27   :  { %p864_p4 = pnand %p862_p3, %p859_p2 }
  0x29   :  { %867 = shalt.err (!%p864_p4)
}
  0x2a   :  { %s868_s20 = scalar_lea.vmem %s41_s11, 2048  ;;  %p873_p6 = scmp.lt.s32.totalorder %s41_s11, %s41_s11 }
  0x2b   :  { %p869_p5 = scmp.ne.s32.totalorder %s41_s11, %s868_s20  ;;  %p874_p7 = scmp.lt.s32.totalorder %s868_s20, %s868_s20 }
  0x2d   :  { %p875_p8 = por %p874_p7, %p873_p6 }
  0x2f   :  { %p876_p9 = pnand %p875_p8, %p869_p5 }
  0x31   :  { %879 = shalt.err (!%p876_p9)
}
  0x32   :  { %46 = dma.hbm_to_vmem [thread:$0]  %s1083_s2, 2048, %s41_s11, [#allocation6], %s910_s24, %s910_s24, %s911_s25  }
  0x33   :  { %902 = dma.done.wait [#allocation3], 1024  }
  0x34   :  { %903 = vsyncadd [#allocation3], 4294966272 }
  0x35   :  { %904 = dma.done.wait [#allocation6], 4096  }
  0x36   :  { %905 = vsyncadd [#allocation6], 4294963200  ;;  %v913_v0 = vmov 0.0|0.0   ;;  %vm914_vm0 = vmmov 0   ;;  %v915_v1 = vmov 0.0   ;;  %v120_v2 = vld [vmem:[#allocation5] sm:$0xff] }
  0x37   :  { %714 = vmatprep.subr.bf16.mxu0 %v913_v0  ;;  %667 = vmatprep.mubr.msk.f32.mxu0 %vm914_vm0, %v915_v1  ;;  %v121_v3 = vld [vmem:[#allocation5 + $0x8] sm:$0xff]  ;;  %v122_v4 = vld [vmem:[#allocation5 + $0x10] sm:$0xff]  ;;  %v123_v6 = vld [vmem:[#allocation5 + $0x18] sm:$0xff]  ;;  %vm144_vm1 = vcmask 1041409   ;;  %vm146_vm2 = vcmask 1042434   ;;  %vm148_vm3 = vcmask 1043459  }
  0x38   :  { %v715_v5 = vpack.c.bf16 %v121_v3, %v120_v2  ;;  %v124_v7 = vld [vmem:[#allocation5 + $0x20] sm:$0xff]  ;;  %v718_v8 = vpack.c.bf16 %v123_v6, %v122_v4  ;;  %v125_v9 = vld [vmem:[#allocation5 + $0x28] sm:$0xff]  ;;  %v126_v10 = vld [vmem:[#allocation5 + $0x30] sm:$0xff]  ;;  %vm150_vm4 = vcmask 1044484   ;;  %vm152_vm5 = vcmask 1045509   ;;  %s917_s2 = smov [#allocation8]  }
  0x39   :  { %v127_v11 = vld [vmem:[#allocation5 + $0x38] sm:$0xff]  ;;  %v992_v12 = vld [vmem:[#allocation5 + $0x40] sm:$0xff]  ;;  %v994_v13 = vld [vmem:[#allocation5 + $0x48] sm:$0xff]  ;;  %v721_v16 = vpack.c.bf16 %v125_v9, %v124_v7  ;;  %vm154_vm6 = vcmask 1046534   ;;  %vm156_vm7 = vcmask 1047559   ;;  %s576_s21 = sshll.u32 %s917_s2, 4  ;;  %s577_s21 = int_to_ptr.vmem [resolvable:$true] %s576_s21 }
  0x3a   :  { %716 = vmatpush3.bf16.msra.mxu0 %v715_v5  ;;  %v996_v14 = vld [vmem:[#allocation2] sm:$0xff]  ;;  %v998_v15 = vld [vmem:[#allocation2 + $0x8] sm:$0xff]  ;;  %v724_v17 = vpack.c.bf16 %v127_v11, %v126_v10  ;;  %v1000_v18 = vld [vmem:[#allocation2 + $0x10] sm:$0xff]  ;;  %v727_v23 = vpack.c.bf16 %v994_v13, %v992_v12  ;;  %s880_s22 = scalar_lea.vmem %s577_s21, 128  ;;  %p885_p11 = scmp.lt.s32.totalorder %s577_s21, %s577_s21 }
  0x3b   :  { %717 = vmatprep.subr.bf16.mxu0 %v913_v0  ;;  %v1002_v19 = vld [vmem:[#allocation2 + $0x18] sm:$0xff]  ;;  %v1004_v20 = vld [vmem:[#allocation2 + $0x20] sm:$0xff]  ;;  %v64_v21 = vrot.slane %v996_v14, 4  ;;  %v70_v22 = vrot.slane %v998_v15, 4  ;;  %v1010_v24 = vld [vmem:[#allocation2 + $0x28] sm:$0xff]  ;;  %v76_v27 = vrot.slane %v1000_v18, 4  ;;  %p881_p10 = scmp.ne.s32.totalorder %s577_s21, %s880_s22  ;;  %p886_p12 = scmp.lt.s32.totalorder %s880_s22, %s880_s22 }
  0x3c   :  { %v1012_v25 = vld [vmem:[#allocation2 + $0x30] sm:$0xff]  ;;  %v1014_v26 = vld [vmem:[#allocation2 + $0x38] sm:$0xff]  ;;  %v82_v28 = vrot.slane %v1002_v19, 4  ;;  %v88_v29 = vrot.slane %v1004_v20, 4  ;;  %v94_v32 = vrot.slane %v1010_v24, 4  ;;  %v329_v9 = vld [vmem:[#allocation7 + $0x8] sm:$0xff] }
  0x3d   :  { %v65_v30 = vadd.f32 %v64_v21, %v996_v14  ;;  %v71_v31 = vadd.f32 %v70_v22, %v998_v15  ;;  %v100_v33 = vrot.slane %v1012_v25, 4  ;;  %v77_v34 = vadd.f32 %v76_v27, %v1000_v18  ;;  %v130_v58 = vld [vmem:[#allocation5 + $0x50] sm:$0xff]  ;;  %v131_v59 = vld [vmem:[#allocation5 + $0x58] sm:$0xff]  ;;  %v333_v12 = vld [vmem:[#allocation7 + $0x28] sm:$0xff]  ;;  %p887_p13 = por %p886_p12, %p885_p11 }
  0x3e   :  { %719 = vmatpush3.bf16.msra.mxu0 %v718_v8  ;;  %v83_v35 = vadd.f32 %v82_v28, %v1002_v19  ;;  %v89_v36 = vadd.f32 %v88_v29, %v1004_v20  ;;  %v106_v37 = vrot.slane %v1014_v26, 4  ;;  %v95_v40 = vadd.f32 %v94_v32, %v1010_v24  ;;  %v328_v8 = vld [vmem:[#allocation7] sm:$0xff]  ;;  %v330_v21 = vld [vmem:[#allocation7 + $0x10] sm:$0xff]  ;;  %v331_v22 = vld [vmem:[#allocation7 + $0x18] sm:$0xff] }
  0x3f   :  { %720 = vmatprep.subr.bf16.mxu0 %v913_v0  ;;  %v66_v38 = vrot.slane %v65_v30, 2  ;;  %v72_v39 = vrot.slane %v71_v31, 2  ;;  %v101_v41 = vadd.f32 %v100_v33, %v1012_v25  ;;  %v78_v42 = vrot.slane %v77_v34, 2  ;;  %v133_v32 = vld [vmem:[#allocation5 + $0x68] sm:$0xff]  ;;  %p888_p0 = pnand %p887_p13, %p881_p10 }
  0x40   :  { %v84_v43 = vrot.slane %v83_v35, 2  ;;  %v90_v44 = vrot.slane %v89_v36, 2  ;;  %v107_v45 = vadd.f32 %v106_v37, %v1014_v26  ;;  %v96_v48 = vrot.slane %v95_v40, 2 }
  0x41   :  { %v67_v46 = vadd.f32 %v66_v38, %v65_v30  ;;  %v73_v47 = vadd.f32 %v72_v39, %v71_v31  ;;  %v102_v49 = vrot.slane %v101_v41, 2  ;;  %v79_v50 = vadd.f32 %v78_v42, %v77_v34  ;;  %v132_v31 = vld [vmem:[#allocation5 + $0x60] sm:$0xff]  ;;  %v134_v42 = vld [vmem:[#allocation5 + $0x70] sm:$0xff] }
  0x42   :  { %722 = vmatpush3.bf16.msra.mxu0 %v721_v16  ;;  %v85_v51 = vadd.f32 %v84_v43, %v83_v35  ;;  %v91_v52 = vadd.f32 %v90_v44, %v89_v36  ;;  %v108_v53 = vrot.slane %v107_v45, 2  ;;  %v97_v56 = vadd.f32 %v96_v48, %v95_v40  ;;  %v332_v39 = vld [vmem:[#allocation7 + $0x20] sm:$0xff]  ;;  %v135_v43 = vld [vmem:[#allocation5 + $0x78] sm:$0xff] }
  0x43   :  { %723 = vmatprep.subr.bf16.mxu0 %v913_v0  ;;  %v68_v54 = vrot.slane %v67_v46, 1  ;;  %v74_v55 = vrot.slane %v73_v47, 1  ;;  %v103_v57 = vadd.f32 %v102_v49, %v101_v41  ;;  %v80_v60 = vrot.slane %v79_v50, 1 }
  0x44   :  { %v86_v61 = vrot.slane %v85_v51, 1  ;;  %v92_v62 = vrot.slane %v91_v52, 1  ;;  %v109_v63 = vadd.f32 %v108_v53, %v107_v45  ;;  %v98_v3 = vrot.slane %v97_v56, 1 }
  0x45   :  { %v69_v1 = vadd.f32 %v68_v54, %v67_v46  ;;  %v75_v2 = vadd.f32 %v74_v55, %v73_v47  ;;  %v104_v4 = vrot.slane %v103_v57, 1  ;;  %v81_v5 = vadd.f32 %v80_v60, %v79_v50  ;;  %v336_v54 = vld [vmem:[#allocation7 + $0x40] sm:$0xff]  ;;  %v337_v55 = vld [vmem:[#allocation7 + $0x48] sm:$0xff] }
  0x46   :  { %725 = vmatpush3.bf16.msra.mxu0 %v724_v17  ;;  %v87_v6 = vadd.f32 %v86_v61, %v85_v51  ;;  %v93_v7 = vadd.f32 %v92_v62, %v91_v52  ;;  %v730_v10 = vpack.c.bf16 %v131_v59, %v130_v58  ;;  %v99_v11 = vadd.f32 %v98_v3, %v97_v56  ;;  %v334_v51 = vld [vmem:[#allocation7 + $0x30] sm:$0xff]  ;;  %v335_v52 = vld [vmem:[#allocation7 + $0x38] sm:$0xff]  ;;  %v340_v59 = vld [vmem:[#allocation7 + $0x60] sm:$0xff] }
  0x47   :  { %726 = vmatprep.subr.bf16.mxu0 %v913_v0  ;;  %v112_v16 = vmul.f32 0.125, %v69_v1  ;;  %v113_v17 = vmul.f32 0.125, %v75_v2  ;;  %v110_v27 = vrot.slane %v109_v63, 1  ;;  %v114_v28 = vmul.f32 0.125, %v81_v5  ;;  %v341_v60 = vld [vmem:[#allocation7 + $0x68] sm:$0xff]  ;;  %v342_v62 = vld [vmem:[#allocation7 + $0x70] sm:$0xff] }
  0x48   :  { %v115_v29 = vmul.f32 0.125, %v87_v6  ;;  %v116_v30 = vmul.f32 0.125, %v93_v7  ;;  %v105_v33 = vadd.f32 %v104_v4, %v103_v57  ;;  %v738_v35 = vpack.c.bf16 %v329_v9, %v328_v8  ;;  %v339_v57 = vld [vmem:[#allocation7 + $0x58] sm:$0xff] }
  0x49   :  { %v145_v34 = vsel %vm144_vm1, %v113_v17, %v112_v16  ;;  %v117_v36 = vmul.f32 0.125, %v99_v11  ;;  %v742_v38 = vpack.c.bf16 %v331_v22, %v330_v21  ;;  %v111_v40 = vadd.f32 %v110_v27, %v109_v63  ;;  %v343_v63 = vld [vmem:[#allocation7 + $0x78] sm:$0xff] }
  0x4a   :  { %728 = vmatpush3.bf16.msra.mxu0 %v727_v23  ;;  %v147_v37 = vsel %vm146_vm2, %v114_v28, %v145_v34  ;;  %739 = vmatprep.subr.bf16.mxu1 %v738_v35  ;;  %v733_v23 = vpack.c.bf16 %v133_v32, %v132_v31  ;;  %v118_v44 = vmul.f32 0.125, %v105_v33  ;;  %v746_v45 = vpack.c.bf16 %v333_v12, %v332_v39 }
  0x4b   :  { %729 = vmatprep.subr.bf16.mxu0 %v913_v0  ;;  %v149_v13 = vsel %vm148_vm3, %v115_v29, %v147_v37  ;;  %741 = vmatpush3.bf16.msra.mxu1 %v738_v35  ;;  %v736_v47 = vpack.c.bf16 %v135_v43, %v134_v42  ;;  %v119_v48 = vmul.f32 0.125, %v111_v40  ;;  %v750_v53 = vpack.c.bf16 %v335_v52, %v334_v51 }
  0x4c   :  { %v151_v41 = vsel %vm150_vm4, %v116_v30, %v149_v13  ;;  %743 = vmatprep.subr.bf16.mxu1 %v742_v38  ;;  %v754_v56 = vpack.c.bf16 %v337_v55, %v336_v54  ;;  %v762_v61 = vpack.c.bf16 %v341_v60, %v340_v59  ;;  %v766_v1 = vpack.c.bf16 %v343_v63, %v342_v62 }
  0x4d   :  { %v153_v46 = vsel %vm152_vm5, %v117_v36, %v151_v41  ;;  %v916_v3 = vmov 1966171168   ;;  %v235_v5 = vlaneseq }
  0x4e   :  { %731 = vmatpush3.bf16.msra.mxu0 %v730_v10  ;;  %v155_v49 = vsel %vm154_vm6, %v118_v44, %v153_v46  ;;  %v233_v4 = vunpack.c.l.s4 %v916_v3 }
  0x4f   :  { %732 = vmatprep.subr.bf16.mxu0 %v913_v0  ;;  %745 = vmatpush3.bf16.msra.mxu1 %v742_v38  ;;  %v157_v50 = vsel %vm156_vm7, %v119_v48, %v155_v49  ;;  %v236_v8 = vshrl.u32 %v235_v5, 7 }
  0x50   :  { %747 = vmatprep.subr.bf16.mxu1 %v746_v45  ;;  %v234_v7 = vunpack.c.0.s8 %v233_v4 }
  0x51   :  { %v282_v17 = vsub.s32 0, %v236_v8 }
  0x52   :  { %734 = vmatpush3.bf16.msra.mxu0 %v733_v23  ;;  %v237_v9 = vsub.s32 %v234_v7, %v236_v8 }
  0x53   :  { %735 = vmatprep.subr.bf16.mxu0 %v913_v0  ;;  %749 = vmatpush3.bf16.msra.mxu1 %v746_v45  ;;  %v338_v0 = vld [vmem:[#allocation7 + $0x50] sm:$0xff] }
  0x54   :  { %751 = vmatprep.subr.bf16.mxu1 %v750_v53  ;;  %v758_v58 = vpack.c.bf16 %v339_v57, %v338_v0 }
  0x56   :  { %737 = vmatpush3.bf16.msra.mxu0 %v736_v47 }
  0x57   :  { %753 = vmatpush3.bf16.msra.mxu1 %v750_v53 }
  0x58   :  { %755 = vmatprep.subr.bf16.mxu1 %v754_v56 }
  0x59   :  { %668 = vmatmul.mubr.f32.vlgmr.msra.gmra.mrb[0].mxu0 %v157_v50 }
  0x5b   :  { %757 = vmatpush3.bf16.msra.mxu1 %v754_v56 }
  0x5c   :  { %759 = vmatprep.subr.bf16.mxu1 %v758_v58 }
  0x5f   :  { %761 = vmatpush3.bf16.msra.mxu1 %v758_v58 }
  0x60   :  { %763 = vmatprep.subr.bf16.mxu1 %v762_v61 }
  0x63   :  { %765 = vmatpush3.bf16.msra.mxu1 %v762_v61 }
  0x64   :  { %767 = vmatprep.subr.bf16.mxu1 %v766_v1 }
  0x67   :  { %769 = vmatpush3.bf16.msra.mxu1 %v766_v1 }
 0x12c   :  { %v225_v2 = vpop.f32.mrb[0].mxu0 }
 0x12d   :  { %780 = vtanh.f32 %v225_v2  ;;  %v669_v6 = vpop.f32.mrb[1].mxu0 }
 0x137   :  { %v781_v10 = vpop.eup %780 }
 0x138   :  { %v231_v11 = vcombine.high %v781_v10, %v781_v10  ;;  %v238_v16 = vrot.slane %v781_v10, %v237_v9 }
 0x13a   :  { %v246_v21 = vcombine.high %v238_v16, %v238_v16  ;;  %v254_v22 = vrot.slane %v238_v16, %v237_v9  ;;  %v245_v27 = vrot.slane %v231_v11, %v237_v9 }
 0x13c   :  { %v276_v28 = vcombine.high %v254_v22, %v254_v22  ;;  %v283_v29 = vrot.slane %v254_v22, %v282_v17  ;;  %v268_v30 = vrot.slane %v246_v21, %v237_v9  ;;  %v261_v31 = vrot.slane %v245_v27, %v237_v9 }
 0x13d   :  { %v247_v32 = vcombine.high %v245_v27, %v245_v27 }
 0x13e   :  { %v320_v33 = vmul.f32 %v283_v29, %v996_v14  ;;  %v287_v34 = vrot.slane %v268_v30, %v282_v17  ;;  %v291_v35 = vrot.slane %v276_v28, %v282_v17  ;;  %v278_v36 = vcombine.high %v268_v30, %v268_v30 }
 0x13f   :  { %v275_v12 = vrot.slane %v247_v32, %v237_v9  ;;  %v299_v13 = vrot.slane %v261_v31, %v282_v17  ;;  %v277_v23 = vcombine.high %v261_v31, %v261_v31 }
 0x140   :  { %702 = vmatprep.mubr.f32.mxu1 %v320_v33  ;;  %v321_v37 = vmul.f32 %v287_v34, %v998_v15  ;;  %v322_v38 = vmul.f32 %v291_v35, %v1000_v18  ;;  %v295_v39 = vrot.slane %v278_v36, %v282_v17 }
 0x141   :  { %v303_v41 = vrot.slane %v275_v12, %v282_v17  ;;  %v279_v42 = vcombine.high %v275_v12, %v275_v12  ;;  %v324_v43 = vmul.f32 %v299_v13, %v1004_v20  ;;  %v307_v44 = vrot.slane %v277_v23, %v282_v17 }
 0x142   :  { %703 = vmatmul.mubr.f32.vlgmr.msra.gmra.mrb[0].mxu1 %v321_v37  ;;  %v323_v40 = vmul.f32 %v295_v39, %v1002_v19 }
 0x143   :  { %705 = vmatprep.mubr.f32.mxu1 %v322_v38  ;;  %v325_v45 = vmul.f32 %v303_v41, %v1010_v24  ;;  %v311_v46 = vrot.slane %v279_v42, %v282_v17  ;;  %v326_v47 = vmul.f32 %v307_v44, %v1012_v25 }
 0x145   :  { %v327_v48 = vmul.f32 %v311_v46, %v1014_v26 }
 0x146   :  { %706 = vmatmul.mubr.f32.gmra.mrb[2].mxu1 %v323_v40 }
 0x147   :  { %708 = vmatprep.mubr.f32.mxu1 %v324_v43 }
 0x14a   :  { %709 = vmatmul.mubr.f32.gmra.mrb[4].mxu1 %v325_v45 }
 0x14b   :  { %711 = vmatprep.mubr.f32.mxu1 %v326_v47 }
 0x14e   :  { %712 = vmatmul.mubr.f32.gmra.mrb[6].mxu1 %v327_v48 }
 0x215   :  { %v704_v49 = vpop.f32.mrb[0].mxu1 }
 0x216   :  { %v587_v50 = vmul.f32 -1.442695, %v704_v49  ;;  %v410_v51 = vpop.f32.mrb[1].mxu1 }
 0x217   :  { %v586_v52 = vmul.f32 -1.442695, %v410_v51 }
 0x218   :  { %782 = vpow2.f32 %v587_v50 }
 0x219   :  { %784 = vpow2.f32 %v586_v52  ;;  %v707_v53 = vpop.f32.mrb[2].mxu1 }
 0x21a   :  { %v589_v54 = vmul.f32 -1.442695, %v707_v53  ;;  %v420_v55 = vpop.f32.mrb[3].mxu1 }
 0x21b   :  { %v588_v56 = vmul.f32 -1.442695, %v420_v55 }
 0x21c   :  { %786 = vpow2.f32 %v589_v54 }
 0x21d   :  { %788 = vpow2.f32 %v588_v56  ;;  %v710_v0 = vpop.f32.mrb[4].mxu1 }
 0x21e   :  { %v591_v57 = vmul.f32 -1.442695, %v710_v0  ;;  %v430_v58 = vpop.f32.mrb[5].mxu1 }
 0x21f   :  { %v590_v59 = vmul.f32 -1.442695, %v430_v58 }
 0x220   :  { %790 = vpow2.f32 %v591_v57 }
 0x221   :  { %792 = vpow2.f32 %v590_v59  ;;  %v713_v60 = vpop.f32.mrb[6].mxu1 }
 0x222   :  { %v783_v61 = vpop.eup %782  ;;  %v593_v62 = vmul.f32 -1.442695, %v713_v60  ;;  %v440_v63 = vpop.f32.mrb[7].mxu1 }
 0x223   :  { %v785_v1 = vpop.eup %784  ;;  %v474_v2 = vadd.f32 1.0, %v783_v61  ;;  %v592_v3 = vmul.f32 -1.442695, %v440_v63 }
 0x224   :  { %v473_v4 = vadd.f32 1.0, %v785_v1  ;;  %794 = vpow2.f32 %v593_v62 }
 0x225   :  { %796 = vrcp.f32 %v474_v2 }
 0x226   :  { %v787_v5 = vpop.eup %786  ;;  %798 = vrcp.f32 %v473_v4 }
 0x227   :  { %v789_v6 = vpop.eup %788  ;;  %v476_v7 = vadd.f32 1.0, %v787_v5  ;;  %800 = vpow2.f32 %v592_v3 }
 0x228   :  { %v475_v8 = vadd.f32 1.0, %v789_v6 }
 0x229   :  { %802 = vrcp.f32 %v476_v7 }
 0x22a   :  { %v791_v9 = vpop.eup %790  ;;  %804 = vrcp.f32 %v475_v8 }
 0x22b   :  { %v793_v10 = vpop.eup %792  ;;  %v478_v11 = vadd.f32 1.0, %v791_v9 }
 0x22c   :  { %v477_v16 = vadd.f32 1.0, %v793_v10 }
 0x22d   :  { %806 = vrcp.f32 %v478_v11 }
 0x22e   :  { %v795_v17 = vpop.eup %794  ;;  %808 = vrcp.f32 %v477_v16 }
 0x22f   :  { %v797_v21 = vpop.eup %796  ;;  %v480_v22 = vadd.f32 1.0, %v795_v17 }
 0x230   :  { %v799_v27 = vpop.eup %798  ;;  %v498_v28 = vmul.f32 %v797_v21, %v998_v15 }
 0x231   :  { %v801_v29 = vpop.eup %800  ;;  %v497_v30 = vmul.f32 %v799_v27, %v996_v14  ;;  %810 = vrcp.f32 %v480_v22 }
 0x232   :  { %v511_v31 = vrot.slane %v498_v28, 4  ;;  %v479_v32 = vadd.f32 1.0, %v801_v29 }
 0x233   :  { %v803_v33 = vpop.eup %802  ;;  %v505_v34 = vrot.slane %v497_v30, 4 }
 0x234   :  { %v805_v35 = vpop.eup %804  ;;  %v512_v36 = vadd.f32 %v511_v31, %v498_v28  ;;  %v500_v37 = vmul.f32 %v803_v33, %v1002_v19  ;;  %812 = vrcp.f32 %v479_v32 }
 0x235   :  { %v506_v38 = vadd.f32 %v505_v34, %v497_v30  ;;  %v499_v39 = vmul.f32 %v805_v35, %v1000_v18 }
 0x236   :  { %v513_v12 = vrot.slane %v512_v36, 2  ;;  %v523_v13 = vrot.slane %v500_v37, 4 }
 0x237   :  { %v807_v23 = vpop.eup %806  ;;  %v507_v15 = vrot.slane %v506_v38, 2  ;;  %v517_v40 = vrot.slane %v499_v39, 4 }
 0x238   :  { %v809_v41 = vpop.eup %808  ;;  %v514_v14 = vadd.f32 %v513_v12, %v512_v36  ;;  %v524_v42 = vadd.f32 %v523_v13, %v500_v37  ;;  %v502_v43 = vmul.f32 %v807_v23, %v1010_v24 }
 0x239   :  { %v508_v44 = vadd.f32 %v507_v15, %v506_v38  ;;  %v518_v45 = vadd.f32 %v517_v40, %v499_v39  ;;  %v501_v46 = vmul.f32 %v809_v41, %v1004_v20 }
 0x23a   :  { %v515_v47 = vrot.slane %v514_v14, 1  ;;  %v525_v19 = vrot.slane %v524_v42, 2  ;;  %v535_v48 = vrot.slane %v502_v43, 4 }
 0x23b   :  { %v811_v49 = vpop.eup %810  ;;  %v509_v50 = vrot.slane %v508_v44, 1  ;;  %v519_v18 = vrot.slane %v518_v45, 2  ;;  %v529_v51 = vrot.slane %v501_v46, 4 }
 0x23c   :  { %v504_v52 = vmul.f32 %v811_v49, %v1014_v26  ;;  %v516_v53 = vadd.f32 %v515_v47, %v514_v14  ;;  %v526_v54 = vadd.f32 %v525_v19, %v524_v42  ;;  %v536_v55 = vadd.f32 %v535_v48, %v502_v43 }
 0x23d   :  { %v520_v56 = vadd.f32 %v519_v18, %v518_v45  ;;  %v530_v0 = vadd.f32 %v529_v51, %v501_v46  ;;  %v510_v57 = vadd.f32 %v509_v50, %v508_v44 }
 0x23e   :  { %v813_v24 = vpop.eup %812  ;;  %v527_v58 = vrot.slane %v526_v54, 1  ;;  %v537_v59 = vrot.slane %v536_v55, 2  ;;  %v547_v60 = vrot.slane %v504_v52, 4 }
 0x23f   :  { %v503_v20 = vmul.f32 %v813_v24, %v1012_v25  ;;  %v521_v61 = vrot.slane %v520_v56, 1  ;;  %v531_v62 = vrot.slane %v530_v0, 2  ;;  %v561_v63 = vsel %vm144_vm1, %v516_v53, %v510_v57 }
 0x240   :  { %v538_v1 = vadd.f32 %v537_v59, %v536_v55  ;;  %v548_v2 = vadd.f32 %v547_v60, %v504_v52  ;;  %v528_v5 = vadd.f32 %v527_v58, %v526_v54 }
 0x241   :  { %v522_v3 = vadd.f32 %v521_v61, %v520_v56  ;;  %v532_v26 = vadd.f32 %v531_v62, %v530_v0  ;;  %v541_v4 = vrot.slane %v503_v20, 4 }
 0x242   :  { %v539_v6 = vrot.slane %v538_v1, 1  ;;  %v549_v7 = vrot.slane %v548_v2, 2 }
 0x243   :  { %v533_v8 = vrot.slane %v532_v26, 1  ;;  %v542_v9 = vadd.f32 %v541_v4, %v503_v20  ;;  %v562_v10 = vsel %vm146_vm2, %v522_v3, %v561_v63 }
 0x244   :  { %v550_v11 = vadd.f32 %v549_v7, %v548_v2  ;;  %v563_v16 = vsel %vm148_vm3, %v528_v5, %v562_v10  ;;  %v540_v21 = vadd.f32 %v539_v6, %v538_v1 }
 0x245   :  { %v534_v25 = vadd.f32 %v533_v8, %v532_v26  ;;  %v543_v17 = vrot.slane %v542_v9, 2 }
 0x246   :  { %v551_v28 = vrot.slane %v550_v11, 1 }
 0x247   :  { %v544_v22 = vadd.f32 %v543_v17, %v542_v9  ;;  %v564_v27 = vsel %vm150_vm4, %v534_v25, %v563_v16 }
 0x248   :  { %v565_v29 = vsel %vm152_vm5, %v540_v21, %v564_v27  ;;  %v552_v32 = vadd.f32 %v551_v28, %v550_v11 }
 0x249   :  { %v545_v30 = vrot.slane %v544_v22, 1 }
 0x24b   :  { %v546_v31 = vadd.f32 %v545_v30, %v544_v22 }
 0x24d   :  { %v566_v33 = vsel %vm154_vm6, %v546_v31, %v565_v29 }
 0x24e   :  { %v567_v34 = vsel %vm156_vm7, %v552_v32, %v566_v33 }
 0x24f   :  { %569 = vst [vmem:[#allocation8] sm:$0xff] %v567_v34 }
 0x250   :  { %891 = shalt.err (!%p888_p0)
}
 0x251   :  { %s892_s25 = scalar_lea.hbm %s1084_s3, 128 }
 0x252   :  { %p893_p1 = scmp.ne.s32.totalorder %s1084_s3, %s892_s25  ;;  %p896_p2 = scmp.lt.u32.totalorder %s892_s25, %s1084_s3 }
 0x254   :  { %p898_p3 = pnand %p896_p2, %p893_p1 }
 0x256   :  { %901 = shalt.err (!%p898_p3)
}
 0x257   :  { %579 = dma.vmem_to_hbm [thread:$0]  %s577_s21, 128, %s1084_s3, [#allocation4]  }
 0x258   :  { %906 = dma.done.wait [#allocation4], 128  }
 0x259   :  { %907 = vsyncadd [#allocation4], 4294967168 }
 0x25a   :  { %583 = vsyncpa [#allocation3], 1 }
 0x25b   :  { %584 = vsyncpa [#allocation6], 1 }
 0x25c   :  { %585 = vsyncpa [#allocation4], 1 }

</bundles_post_ra>
